<compile_context>
chip_gen: v6e
topology: v6e:2x2x1
jax: 0.10.0
libtpu: 0.0.40
codegen_flags: <defaults>
</compile_context>

<pallas_src>
import jax
import jax.numpy as jnp
import numpy as np
from jax import lax
from jax.experimental import pallas as pl
from jax.experimental.pallas import tpu as pltpu

NUM_T = 5  # forward() uses threshold[:, 0..4] and predict[:, 0..4]


def _round_up(x, m):
    return ((x + m - 1) // m) * m


def _make_kernel(c_res, c_stride, Np, TR, n_real):
    rows = NUM_T * c_stride  # stacked (threshold, channel) mask rows, 8-aligned slabs

    def kernel(thr_ref, pred_ref, fm_ref, x_ref, out_ref, mask_ref, wm_ref, acc_ref):
        bidx = pl.program_id(0)
        j = pl.program_id(1)
        nj = pl.num_programs(1)

        # ---- per-batch init: build stacked mask and w_t*(mask-1) once ----
        @pl.when(j == 0)
        def _init():
            acc_ref[0] = jnp.float32(0.0)   # loss_all
            acc_ref[1] = jnp.float32(0.0)   # sum_t w_t * (Q_t - P_t)
            mask_ref[...] = jnp.zeros_like(mask_ref)
            wm_ref[...] = jnp.zeros_like(wm_ref)
            x = x_ref[0]                                        # (c, Np)
            for t in range(NUM_T):
                thr_t = thr_ref[bidx, t]                        # SMEM scalar
                w_t = pred_ref[bidx, t]                         # SMEM scalar
                m_t = (x > thr_t).astype(jnp.float32)           # (c, Np)
                r0 = t * c_stride                               # 8-aligned static offset
                mask_ref[r0:r0 + c_res, :] = m_t
                wm_ref[r0:r0 + c_res, :] = w_t * (m_t - 1.0)
            # all-ones row: rowsum(Dot) (=> loss_all) rides the same MXU matmul.
            mask_ref[rows:rows + 1, :] = jnp.ones((1, Np), jnp.float32)

        # ---- similarity row-block (TR, Np) ----
        col0 = pl.multiple_of(j * TR, 128)
        fm_full = fm_ref[0]                                     # (C, Np)
        fm_rows = fm_ref[0, :, pl.ds(col0, TR)]                 # (C, TR) in-VMEM slice

        # A^T.B form: contract over the channel dim of both operands (no transpose).
        cos = lax.dot_general(fm_rows, fm_full, (((0,), (0,)), ((), ())),
                              preferred_element_type=jnp.float32)   # (TR, Np)
        cos = jnp.clip(cos, -1.0 + 1e-07, 1.0 - 1e-07)
        # 1 - 2*sigmoid(-sqrt(2-2cos)) == tanh(0.5*sqrt(2-2cos))  (single EUP chain)
        dot_blk = jnp.tanh(0.5 * jnp.sqrt(2.0 - 2.0 * cos))         # (TR, Np)

        if Np != n_real:  # zero padded rows / columns of Dot (static Python branch)
            col_ids = lax.broadcasted_iota(jnp.int32, (TR, Np), 1)
            row_ids = lax.broadcasted_iota(jnp.int32, (TR, Np), 0) + j * TR
            dot_blk = jnp.where((col_ids < n_real) & (row_ids < n_real), dot_blk, 0.0)

        # h[r, i] = sum_n M[r, n] * Dot[i, n] : one stacked matmul, contraction = Np.
        h = lax.dot_general(mask_ref[...], dot_blk, (((1,), (1,)), ((), ())),
                            preferred_element_type=jnp.float32)     # (rows+1, TR)

        wm_rows = wm_ref[:, pl.ds(col0, TR)]                        # (rows, TR)
        acc_ref[0] += jnp.sum(h[rows:rows + 1, :])                  # loss_all partial
        acc_ref[1] += jnp.sum(wm_rows * h[:rows, :])                # sum_t w_t*(Q_t-P_t)

        @pl.when(j == nj - 1)
        def _finalize():
            wsum = pred_ref[bidx, 0]
            for t in range(1, NUM_T):
                wsum = wsum + pred_ref[bidx, t]
            val = 2.0 * acc_ref[1] / acc_ref[0] + jnp.float32(c_res) * wsum
            out_ref[...] = jnp.full(out_ref.shape, val, dtype=jnp.float32)

    return kernel


@jax.jit
def finetune_loss(X, f_map, threshold, predict):
    B, C, W, H = f_map.shape
    b, c, w, h = X.shape
    N = W * H
    assert b == B and w * h == N, "result spatial size must match f_map spatial size"

    Np = _round_up(N, 128)

    # Channel-major feature map (free row-major reshape of NCHW) and torch-style
    # .view(b, N, c) of X, transposed to lane-dense (c, N).
    fm = f_map.reshape(B, C, N).astype(jnp.float32)
    xv = jnp.swapaxes(X.reshape(B, N, c), 1, 2).astype(jnp.float32)     # (B, c, N)
    if Np != N:
        fm = jnp.pad(fm, ((0, 0), (0, 0), (0, Np - N)))
        xv = jnp.pad(xv, ((0, 0), (0, 0), (0, Np - N)))

    thr = threshold[:, :NUM_T].astype(jnp.float32)                      # (B, 5) -> SMEM
    prd = predict[:, :NUM_T].astype(jnp.float32)                        # (B, 5) -> SMEM

    # Row-block size over the (padded) NxN similarity matrix.
    TR = 128
    for cand in (1024, 512, 256, 128):
        if Np % cand == 0:
            TR = cand
            break
    while TR > 128 and 3 * TR * Np * 4 > (20 << 20):   # keep (TR,Np) temps bounded
        TR //= 2
    J = Np // TR

    c_stride = _round_up(c, 8)          # 8-aligned per-threshold slab in the scratch
    rows = NUM_T * c_stride

    # VMEM sizing from the actual resident set (double-buffered inputs + scratches +
    # the (TR,Np) intermediates), clamped to be safe on 64 MiB parts.
    vmem_bytes = 4 * Np * (2 * C + 2 * c + 2 * rows + 1 + 3 * TR) + (2 << 20)
    vmem_limit = int(min(max(vmem_bytes, 32 << 20), 64 << 20))

    kernel = _make_kernel(c, c_stride, Np, TR, N)

    out = pl.pallas_call(
        kernel,
        out_shape=jax.ShapeDtypeStruct((B, 1, 128), jnp.float32),
        grid=(B, J),
        in_specs=[
            pl.BlockSpec(memory_space=pltpu.MemorySpace.SMEM),       # threshold (B, 5)
            pl.BlockSpec(memory_space=pltpu.MemorySpace.SMEM),       # predict   (B, 5)
            pl.BlockSpec((1, C, Np), lambda bb, jj: (bb, 0, 0)),     # fm, j-invariant
            pl.BlockSpec((1, c, Np), lambda bb, jj: (bb, 0, 0)),     # X,  j-invariant
        ],
        out_specs=pl.BlockSpec((1, 1, 128), lambda bb, jj: (bb, 0, 0)),
        scratch_shapes=[
            pltpu.VMEM((rows + 1, Np), jnp.float32),   # stacked masks + all-ones row
            pltpu.VMEM((rows, Np), jnp.float32),       # w_t * (mask - 1)
            pltpu.SMEM((2,), jnp.float32),             # [loss_all, sum_t w_t (Q_t-P_t)]
        ],
        compiler_params=pltpu.CompilerParams(
            dimension_semantics=("parallel", "arbitrary"),
            vmem_limit_bytes=vmem_limit,
        ),
    )(thr, prd, fm, xv)

    return jnp.mean(out[:, 0, 0])


# ---------------- pure-JAX reference (mirrors the PyTorch module) ----------------
def _ref_forward_dist(result, f_map, vit_T):
    B, C, W, H = f_map.shape
    fm = jnp.transpose(f_map, (0, 2, 3, 1)).reshape(B, W * H, C)
    cos = fm @ jnp.swapaxes(fm, 1, 2)
    cos = jnp.clip(cos, -1.0 + 1e-07, 1.0 - 1e-07)
    dot = 1.0 - 2.0 * jax.nn.sigmoid(-jnp.sqrt(2.0 - 2.0 * cos))
    b, c, w, h = result.shape
    mask = (result > vit_T[:, None, None, None]).astype(jnp.float32)
    neg = (result <= vit_T[:, None, None, None]).astype(jnp.float32)
    mask = mask.reshape(b, w * h, c)
    neg = neg.reshape(b, w * h, c)
    M = mask @ jnp.swapaxes(mask, 1, 2)
    Mn = neg @ jnp.swapaxes(neg, 1, 2)
    loss_pos = (dot * M).sum((-1, -2)) + (dot * Mn).sum((-1, -2))
    loss_all = dot.sum((-1, -2))
    return loss_pos / loss_all


def _ref_forward(X, f_map, threshold, predict):
    loss = sum(
        _ref_forward_dist(X, f_map, threshold[:, t]) * predict[:, t]
        for t in range(NUM_T)
    )
    return loss.mean()


if __name__ == "__main__":
    # FinetuneLoss has no learnable parameters; only inputs are needed.
    key = jax.random.PRNGKey(0)
    k1, k2, k3, k4 = jax.random.split(key, 4)

    B, C, W, H = 2, 32, 8, 8      # f_map: (B, C, W, H)
    b, c, w, h = 2, 4, 8, 8       # X (result): (b, c, w, h), w*h == W*H

    f_map = jax.random.normal(k1, (B, C, W, H), dtype=jnp.float32)
    X = jax.random.normal(k2, (b, c, w, h), dtype=jnp.float32)
    threshold = jax.random.uniform(k3, (B, NUM_T), dtype=jnp.float32, minval=-0.5, maxval=0.5)
    predict = jax.nn.softmax(jax.random.normal(k4, (B, NUM_T), dtype=jnp.float32), axis=-1)

    out = jax.block_until_ready(finetune_loss(X, f_map, threshold, predict))

    ref = jax.block_until_ready(_ref_forward(X, f_map, threshold, predict))
    np.testing.assert_allclose(np.asarray(out), np.asarray(ref), rtol=1e-3, atol=1e-3)

    print("KERNEL_OK")
</pallas_src>

<mosaic_0001>
module attributes {stable_mosaic.version = 11 : i64} {
  func.func @kernel(%arg0: i32, %arg1: i32, %arg2: memref<2x5xf32, #tpu.memory_space<smem>>, %arg3: memref<2x5xf32, #tpu.memory_space<smem>>, %arg4: memref<1x32x128xf32, #tpu.memory_space<vmem>>, %arg5: memref<1x4x128xf32, #tpu.memory_space<vmem>>, %arg6: memref<1x1x128xf32, #tpu.memory_space<vmem>>, %arg7: memref<41x128xf32, #tpu.memory_space<vmem>>, %arg8: memref<40x128xf32, #tpu.memory_space<vmem>>, %arg9: memref<2xf32, #tpu.memory_space<smem>>) attributes {dimension_semantics = [#tpu.dimension_semantics<parallel>, #tpu.dimension_semantics<arbitrary>], iteration_bounds = array<i64: 2, 1>, scalar_prefetch = 0 : i64, scratch_operands = 3 : i64, tpu.core_type = #tpu.core_type<tc>, window_params = [{transform_indices = @transform_0, window_bounds = array<i64: 2, 5>}, {transform_indices = @transform_1, window_bounds = array<i64: 2, 5>}, {transform_indices = @transform_2, window_bounds = array<i64: 1, 32, 128>}, {transform_indices = @transform_3, window_bounds = array<i64: 1, 4, 128>}, {transform_indices = @transform_4, window_bounds = array<i64: 1, 1, 128>}]} {
    %c0_i32 = arith.constant 0 : i32
    %0 = arith.cmpi eq, %arg1, %c0_i32 : i32
    %1 = arith.extui %0 : i1 to i32
    %c0_i32_0 = arith.constant 0 : i32
    %2 = arith.cmpi ne, %1, %c0_i32_0 : i32
    scf.if %2 {
      %cst_24 = arith.constant 0.000000e+00 : f32
      %c0_25 = arith.constant 0 : index
      %59 = memref.load %arg9[%c0_25] : memref<2xf32, #tpu.memory_space<smem>>
      memref.store %cst_24, %arg9[%c0_25] : memref<2xf32, #tpu.memory_space<smem>>
      %cst_26 = arith.constant 0.000000e+00 : f32
      %c1_27 = arith.constant 1 : index
      %60 = memref.load %arg9[%c1_27] : memref<2xf32, #tpu.memory_space<smem>>
      memref.store %cst_26, %arg9[%c1_27] : memref<2xf32, #tpu.memory_space<smem>>
      %cst_28 = arith.constant 0.000000e+00 : f32
      %61 = vector.broadcast %cst_28 : f32 to vector<41x128xf32>
      %c0_29 = arith.constant 0 : index
      %c0_30 = arith.constant 0 : index
      %62 = vector.load %arg7[%c0_29, %c0_30] : memref<41x128xf32, #tpu.memory_space<vmem>>, vector<41x128xf32>
      tpu.vector_store %arg7[%c0_29, %c0_30], %61 {strides = array<i32>} : memref<41x128xf32, #tpu.memory_space<vmem>>, vector<41x128xf32>,
      %cst_31 = arith.constant 0.000000e+00 : f32
      %63 = vector.broadcast %cst_31 : f32 to vector<40x128xf32>
      %c0_32 = arith.constant 0 : index
      %c0_33 = arith.constant 0 : index
      %64 = vector.load %arg8[%c0_32, %c0_33] : memref<40x128xf32, #tpu.memory_space<vmem>>, vector<40x128xf32>
      tpu.vector_store %arg8[%c0_32, %c0_33], %63 {strides = array<i32>} : memref<40x128xf32, #tpu.memory_space<vmem>>, vector<40x128xf32>,
      %c0_34 = arith.constant 0 : index
      %c0_35 = arith.constant 0 : index
      %c0_36 = arith.constant 0 : index
      %65 = vector.load %arg5[%c0_34, %c0_35, %c0_36] : memref<1x4x128xf32, #tpu.memory_space<vmem>>, vector<1x4x128xf32>
      %66 = vector.shape_cast %65 : vector<1x4x128xf32> to vector<4x128xf32>
      %67 = arith.index_cast %arg0 : i32 to index
      %c0_37 = arith.constant 0 : index
      %68 = memref.load %arg2[%67, %c0_37] : memref<2x5xf32, #tpu.memory_space<smem>>
      %69 = arith.index_cast %arg0 : i32 to index
      %c0_38 = arith.constant 0 : index
      %70 = memref.load %arg3[%69, %c0_38] : memref<2x5xf32, #tpu.memory_space<smem>>
      %71 = vector.broadcast %68 : f32 to vector<4x128xf32>
      %72 = arith.cmpf ogt, %66, %71 : vector<4x128xf32>
      %73 = arith.extui %72 : vector<4x128xi1> to vector<4x128xi32>
      %74 = arith.sitofp %73 : vector<4x128xi32> to vector<4x128xf32>
      %c0_39 = arith.constant 0 : index
      %c0_40 = arith.constant 0 : index
      %75 = vector.load %arg7[%c0_39, %c0_40] : memref<41x128xf32, #tpu.memory_space<vmem>>, vector<4x128xf32>
      tpu.vector_store %arg7[%c0_39, %c0_40], %74 {strides = array<i32>} : memref<41x128xf32, #tpu.memory_space<vmem>>, vector<4x128xf32>,
      %cst_41 = arith.constant 1.000000e+00 : f32
      %76 = vector.broadcast %cst_41 : f32 to vector<4x128xf32>
      %77 = arith.subf %74, %76 : vector<4x128xf32>
      %78 = vector.broadcast %70 : f32 to vector<4x128xf32>
      %79 = arith.mulf %78, %77 : vector<4x128xf32>
      %c0_42 = arith.constant 0 : index
      %c0_43 = arith.constant 0 : index
      %80 = vector.load %arg8[%c0_42, %c0_43] : memref<40x128xf32, #tpu.memory_space<vmem>>, vector<4x128xf32>
      tpu.vector_store %arg8[%c0_42, %c0_43], %79 {strides = array<i32>} : memref<40x128xf32, #tpu.memory_space<vmem>>, vector<4x128xf32>,
      %81 = arith.index_cast %arg0 : i32 to index
      %c1_44 = arith.constant 1 : index
      %82 = memref.load %arg2[%81, %c1_44] : memref<2x5xf32, #tpu.memory_space<smem>>
      %83 = arith.index_cast %arg0 : i32 to index
      %c1_45 = arith.constant 1 : index
      %84 = memref.load %arg3[%83, %c1_45] : memref<2x5xf32, #tpu.memory_space<smem>>
      %85 = vector.broadcast %82 : f32 to vector<4x128xf32>
      %86 = arith.cmpf ogt, %66, %85 : vector<4x128xf32>
      %87 = arith.extui %86 : vector<4x128xi1> to vector<4x128xi32>
      %88 = arith.sitofp %87 : vector<4x128xi32> to vector<4x128xf32>
      %c8 = arith.constant 8 : index
      %c0_46 = arith.constant 0 : index
      %89 = vector.load %arg7[%c8, %c0_46] : memref<41x128xf32, #tpu.memory_space<vmem>>, vector<4x128xf32>
      tpu.vector_store %arg7[%c8, %c0_46], %88 {strides = array<i32>} : memref<41x128xf32, #tpu.memory_space<vmem>>, vector<4x128xf32>,
      %cst_47 = arith.constant 1.000000e+00 : f32
      %90 = vector.broadcast %cst_47 : f32 to vector<4x128xf32>
      %91 = arith.subf %88, %90 : vector<4x128xf32>
      %92 = vector.broadcast %84 : f32 to vector<4x128xf32>
      %93 = arith.mulf %92, %91 : vector<4x128xf32>
      %c8_48 = arith.constant 8 : index
      %c0_49 = arith.constant 0 : index
      %94 = vector.load %arg8[%c8_48, %c0_49] : memref<40x128xf32, #tpu.memory_space<vmem>>, vector<4x128xf32>
      tpu.vector_store %arg8[%c8_48, %c0_49], %93 {strides = array<i32>} : memref<40x128xf32, #tpu.memory_space<vmem>>, vector<4x128xf32>,
      %95 = arith.index_cast %arg0 : i32 to index
      %c2 = arith.constant 2 : index
      %96 = memref.load %arg2[%95, %c2] : memref<2x5xf32, #tpu.memory_space<smem>>
      %97 = arith.index_cast %arg0 : i32 to index
      %c2_50 = arith.constant 2 : index
      %98 = memref.load %arg3[%97, %c2_50] : memref<2x5xf32, #tpu.memory_space<smem>>
      %99 = vector.broadcast %96 : f32 to vector<4x128xf32>
      %100 = arith.cmpf ogt, %66, %99 : vector<4x128xf32>
      %101 = arith.extui %100 : vector<4x128xi1> to vector<4x128xi32>
      %102 = arith.sitofp %101 : vector<4x128xi32> to vector<4x128xf32>
      %c16 = arith.constant 16 : index
      %c0_51 = arith.constant 0 : index
      %103 = vector.load %arg7[%c16, %c0_51] : memref<41x128xf32, #tpu.memory_space<vmem>>, vector<4x128xf32>
      tpu.vector_store %arg7[%c16, %c0_51], %102 {strides = array<i32>} : memref<41x128xf32, #tpu.memory_space<vmem>>, vector<4x128xf32>,
      %cst_52 = arith.constant 1.000000e+00 : f32
      %104 = vector.broadcast %cst_52 : f32 to vector<4x128xf32>
      %105 = arith.subf %102, %104 : vector<4x128xf32>
      %106 = vector.broadcast %98 : f32 to vector<4x128xf32>
      %107 = arith.mulf %106, %105 : vector<4x128xf32>
      %c16_53 = arith.constant 16 : index
      %c0_54 = arith.constant 0 : index
      %108 = vector.load %arg8[%c16_53, %c0_54] : memref<40x128xf32, #tpu.memory_space<vmem>>, vector<4x128xf32>
      tpu.vector_store %arg8[%c16_53, %c0_54], %107 {strides = array<i32>} : memref<40x128xf32, #tpu.memory_space<vmem>>, vector<4x128xf32>,
      %109 = arith.index_cast %arg0 : i32 to index
      %c3 = arith.constant 3 : index
      %110 = memref.load %arg2[%109, %c3] : memref<2x5xf32, #tpu.memory_space<smem>>
      %111 = arith.index_cast %arg0 : i32 to index
      %c3_55 = arith.constant 3 : index
      %112 = memref.load %arg3[%111, %c3_55] : memref<2x5xf32, #tpu.memory_space<smem>>
      %113 = vector.broadcast %110 : f32 to vector<4x128xf32>
      %114 = arith.cmpf ogt, %66, %113 : vector<4x128xf32>
      %115 = arith.extui %114 : vector<4x128xi1> to vector<4x128xi32>
      %116 = arith.sitofp %115 : vector<4x128xi32> to vector<4x128xf32>
      %c24 = arith.constant 24 : index
      %c0_56 = arith.constant 0 : index
      %117 = vector.load %arg7[%c24, %c0_56] : memref<41x128xf32, #tpu.memory_space<vmem>>, vector<4x128xf32>
      tpu.vector_store %arg7[%c24, %c0_56], %116 {strides = array<i32>} : memref<41x128xf32, #tpu.memory_space<vmem>>, vector<4x128xf32>,
      %cst_57 = arith.constant 1.000000e+00 : f32
      %118 = vector.broadcast %cst_57 : f32 to vector<4x128xf32>
      %119 = arith.subf %116, %118 : vector<4x128xf32>
      %120 = vector.broadcast %112 : f32 to vector<4x128xf32>
      %121 = arith.mulf %120, %119 : vector<4x128xf32>
      %c24_58 = arith.constant 24 : index
      %c0_59 = arith.constant 0 : index
      %122 = vector.load %arg8[%c24_58, %c0_59] : memref<40x128xf32, #tpu.memory_space<vmem>>, vector<4x128xf32>
      tpu.vector_store %arg8[%c24_58, %c0_59], %121 {strides = array<i32>} : memref<40x128xf32, #tpu.memory_space<vmem>>, vector<4x128xf32>,
      %123 = arith.index_cast %arg0 : i32 to index
      %c4 = arith.constant 4 : index
      %124 = memref.load %arg2[%123, %c4] : memref<2x5xf32, #tpu.memory_space<smem>>
      %125 = arith.index_cast %arg0 : i32 to index
      %c4_60 = arith.constant 4 : index
      %126 = memref.load %arg3[%125, %c4_60] : memref<2x5xf32, #tpu.memory_space<smem>>
      %127 = vector.broadcast %124 : f32 to vector<4x128xf32>
      %128 = arith.cmpf ogt, %66, %127 : vector<4x128xf32>
      %129 = arith.extui %128 : vector<4x128xi1> to vector<4x128xi32>
      %130 = arith.sitofp %129 : vector<4x128xi32> to vector<4x128xf32>
      %c32 = arith.constant 32 : index
      %c0_61 = arith.constant 0 : index
      %131 = vector.load %arg7[%c32, %c0_61] : memref<41x128xf32, #tpu.memory_space<vmem>>, vector<4x128xf32>
      tpu.vector_store %arg7[%c32, %c0_61], %130 {strides = array<i32>} : memref<41x128xf32, #tpu.memory_space<vmem>>, vector<4x128xf32>,
      %cst_62 = arith.constant 1.000000e+00 : f32
      %132 = vector.broadcast %cst_62 : f32 to vector<4x128xf32>
      %133 = arith.subf %130, %132 : vector<4x128xf32>
      %134 = vector.broadcast %126 : f32 to vector<4x128xf32>
      %135 = arith.mulf %134, %133 : vector<4x128xf32>
      %c32_63 = arith.constant 32 : index
      %c0_64 = arith.constant 0 : index
      %136 = vector.load %arg8[%c32_63, %c0_64] : memref<40x128xf32, #tpu.memory_space<vmem>>, vector<4x128xf32>
      tpu.vector_store %arg8[%c32_63, %c0_64], %135 {strides = array<i32>} : memref<40x128xf32, #tpu.memory_space<vmem>>, vector<4x128xf32>,
      %cst_65 = arith.constant 1.000000e+00 : f32
      %137 = vector.broadcast %cst_65 : f32 to vector<1x128xf32>
      %c40 = arith.constant 40 : index
      %c0_66 = arith.constant 0 : index
      %138 = vector.load %arg7[%c40, %c0_66] : memref<41x128xf32, #tpu.memory_space<vmem>>, vector<1x128xf32>
      tpu.vector_store %arg7[%c40, %c0_66], %137 {strides = array<i32>} : memref<41x128xf32, #tpu.memory_space<vmem>>, vector<1x128xf32>,
    } else {
    }
    %c128_i32 = arith.constant 128 : i32
    %3 = arith.muli %arg1, %c128_i32 : i32
    %4 = tpu.assume_multiple %3, 128 : i32
    %c0 = arith.constant 0 : index
    %c0_1 = arith.constant 0 : index
    %c0_2 = arith.constant 0 : index
    %5 = vector.load %arg4[%c0, %c0_1, %c0_2] : memref<1x32x128xf32, #tpu.memory_space<vmem>>, vector<1x32x128xf32>
    %6 = vector.shape_cast %5 : vector<1x32x128xf32> to vector<32x128xf32>
    %c0_3 = arith.constant 0 : index
    %c0_4 = arith.constant 0 : index
    %7 = arith.index_cast %4 : i32 to index
    %8 = vector.load %arg4[%c0_3, %c0_4, %7] : memref<1x32x128xf32, #tpu.memory_space<vmem>>, vector<1x32x128xf32>
    %9 = vector.shape_cast %8 : vector<1x32x128xf32> to vector<32x128xf32>
    %cst = arith.constant dense<0.000000e+00> : vector<128x128xf32>
    %10 = tpu.matmul %9, %6, %cst {dimension_numbers = #tpu.dot_dimension_numbers<[0], [0], [1], [1], [0, 1, 1, 1], [], []>} : vector<32x128xf32>, vector<32x128xf32>, vector<128x128xf32> -> vector<128x128xf32>
    %cst_5 = arith.constant -0.99999988 : f32
    %cst_6 = arith.constant 0.99999988 : f32
    %11 = vector.broadcast %cst_5 : f32 to vector<128x128xf32>
    %12 = arith.maximumf %11, %10 : vector<128x128xf32>
    %13 = vector.broadcast %cst_6 : f32 to vector<128x128xf32>
    %14 = arith.minimumf %13, %12 : vector<128x128xf32>
    %cst_7 = arith.constant 2.000000e+00 : f32
    %15 = vector.broadcast %cst_7 : f32 to vector<128x128xf32>
    %16 = arith.mulf %15, %14 : vector<128x128xf32>
    %cst_8 = arith.constant 2.000000e+00 : f32
    %17 = vector.broadcast %cst_8 : f32 to vector<128x128xf32>
    %18 = arith.subf %17, %16 : vector<128x128xf32>
    %19 = math.sqrt %18 : vector<128x128xf32>
    %cst_9 = arith.constant 5.000000e-01 : f32
    %20 = vector.broadcast %cst_9 : f32 to vector<128x128xf32>
    %21 = arith.mulf %20, %19 : vector<128x128xf32>
    %22 = math.tanh %21 : vector<128x128xf32>
    %23 = tpu.iota {dimensions = array<i32: 1>} : vector<128x128xi32>
    %24 = tpu.iota {dimensions = array<i32: 0>} : vector<128x128xi32>
    %c128_i32_10 = arith.constant 128 : i32
    %25 = arith.muli %arg1, %c128_i32_10 : i32
    %26 = vector.broadcast %25 : i32 to vector<128x128xi32>
    %27 = arith.addi %24, %26 : vector<128x128xi32>
    %c64_i32 = arith.constant 64 : i32
    %28 = vector.broadcast %c64_i32 : i32 to vector<128x128xi32>
    %29 = arith.cmpi slt, %23, %28 : vector<128x128xi32>
    %c64_i32_11 = arith.constant 64 : i32
    %30 = vector.broadcast %c64_i32_11 : i32 to vector<128x128xi32>
    %31 = arith.cmpi slt, %27, %30 : vector<128x128xi32>
    %32 = arith.andi %29, %31 : vector<128x128xi1>
    %cst_12 = arith.constant 0.000000e+00 : f32
    %33 = vector.broadcast %cst_12 : f32 to vector<128x128xf32>
    %34 = arith.select %32, %22, %33 : vector<128x128xi1>, vector<128x128xf32>
    %c0_13 = arith.constant 0 : index
    %c0_14 = arith.constant 0 : index
    %35 = vector.load %arg7[%c0_13, %c0_14] : memref<41x128xf32, #tpu.memory_space<vmem>>, vector<41x128xf32>
    %cst_15 = arith.constant dense<0.000000e+00> : vector<41x128xf32>
    %36 = tpu.matmul %35, %34, %cst_15 {dimension_numbers = #tpu.dot_dimension_numbers<[1], [1], [0], [0], [0, 0, 1, 0], [], []>} : vector<41x128xf32>, vector<128x128xf32>, vector<41x128xf32> -> vector<41x128xf32>
    %c0_16 = arith.constant 0 : index
    %37 = arith.index_cast %4 : i32 to index
    %38 = vector.load %arg8[%c0_16, %37] : memref<40x128xf32, #tpu.memory_space<vmem>>, vector<40x128xf32>
    %c0_17 = arith.constant 0 : index
    %39 = memref.load %arg9[%c0_17] : memref<2xf32, #tpu.memory_space<smem>>
    %40 = vector.extract_strided_slice %36 {offsets = [40, 0], sizes = [1, 128], strides = [1, 1]} : vector<41x128xf32> to vector<1x128xf32>
    %41 = vector.shape_cast %40 : vector<1x128xf32> to vector<1x1x128xf32>
    %cst_18 = arith.constant dense<0.000000e+00> : vector<1xf32>
    %42 = vector.multi_reduction <add>, %41, %cst_18 [1, 2] : vector<1x1x128xf32> to vector<1xf32>
    %43 = vector.shape_cast %42 : vector<1xf32> to vector<1x1x1xf32>
    %44 = vector.extract %43[0, 0, 0] : f32 from vector<1x1x1xf32>
    %45 = arith.addf %39, %44 : f32
    %c0_19 = arith.constant 0 : index
    %46 = memref.load %arg9[%c0_19] : memref<2xf32, #tpu.memory_space<smem>>
    memref.store %45, %arg9[%c0_19] : memref<2xf32, #tpu.memory_space<smem>>
    %c1 = arith.constant 1 : index
    %47 = memref.load %arg9[%c1] : memref<2xf32, #tpu.memory_space<smem>>
    %48 = vector.extract_strided_slice %36 {offsets = [0, 0], sizes = [40, 128], strides = [1, 1]} : vector<41x128xf32> to vector<40x128xf32>
    %49 = arith.mulf %38, %48 : vector<40x128xf32>
    %50 = vector.shape_cast %49 : vector<40x128xf32> to vector<1x40x128xf32>
    %cst_20 = arith.constant dense<0.000000e+00> : vector<1xf32>
    %51 = vector.multi_reduction <add>, %50, %cst_20 [1, 2] : vector<1x40x128xf32> to vector<1xf32>
    %52 = vector.shape_cast %51 : vector<1xf32> to vector<1x1x1xf32>
    %53 = vector.extract %52[0, 0, 0] : f32 from vector<1x1x1xf32>
    %54 = arith.addf %47, %53 : f32
    %c1_21 = arith.constant 1 : index
    %55 = memref.load %arg9[%c1_21] : memref<2xf32, #tpu.memory_space<smem>>
    memref.store %54, %arg9[%c1_21] : memref<2xf32, #tpu.memory_space<smem>>
    %c0_i32_22 = arith.constant 0 : i32
    %56 = arith.cmpi eq, %arg1, %c0_i32_22 : i32
    %57 = arith.extui %56 : i1 to i32
    %c0_i32_23 = arith.constant 0 : i32
    %58 = arith.cmpi ne, %57, %c0_i32_23 : i32
    scf.if %58 {
      %59 = arith.index_cast %arg0 : i32 to index
      %c0_24 = arith.constant 0 : index
      %60 = memref.load %arg3[%59, %c0_24] : memref<2x5xf32, #tpu.memory_space<smem>>
      %61 = arith.index_cast %arg0 : i32 to index
      %c1_25 = arith.constant 1 : index
      %62 = memref.load %arg3[%61, %c1_25] : memref<2x5xf32, #tpu.memory_space<smem>>
      %63 = arith.addf %60, %62 : f32
      %64 = arith.index_cast %arg0 : i32 to index
      %c2 = arith.constant 2 : index
      %65 = memref.load %arg3[%64, %c2] : memref<2x5xf32, #tpu.memory_space<smem>>
      %66 = arith.addf %63, %65 : f32
      %67 = arith.index_cast %arg0 : i32 to index
      %c3 = arith.constant 3 : index
      %68 = memref.load %arg3[%67, %c3] : memref<2x5xf32, #tpu.memory_space<smem>>
      %69 = arith.addf %66, %68 : f32
      %70 = arith.index_cast %arg0 : i32 to index
      %c4 = arith.constant 4 : index
      %71 = memref.load %arg3[%70, %c4] : memref<2x5xf32, #tpu.memory_space<smem>>
      %72 = arith.addf %69, %71 : f32
      %c1_26 = arith.constant 1 : index
      %73 = memref.load %arg9[%c1_26] : memref<2xf32, #tpu.memory_space<smem>>
      %cst_27 = arith.constant 2.000000e+00 : f32
      %74 = arith.mulf %cst_27, %73 : f32
      %c0_28 = arith.constant 0 : index
      %75 = memref.load %arg9[%c0_28] : memref<2xf32, #tpu.memory_space<smem>>
      %76 = arith.divf %74, %75 : f32
      %cst_29 = arith.constant 4.000000e+00 : f32
      %77 = arith.mulf %cst_29, %72 : f32
      %78 = arith.addf %76, %77 : f32
      %79 = vector.broadcast %78 : f32 to vector<1x1x128xf32>
      %c0_30 = arith.constant 0 : index
      %c0_31 = arith.constant 0 : index
      %c0_32 = arith.constant 0 : index
      %80 = vector.load %arg6[%c0_30, %c0_31, %c0_32] : memref<1x1x128xf32, #tpu.memory_space<vmem>>, vector<1x1x128xf32>
      tpu.vector_store %arg6[%c0_30, %c0_31, %c0_32], %79 {strides = array<i32>} : memref<1x1x128xf32, #tpu.memory_space<vmem>>, vector<1x1x128xf32>,
    } else {
    }
    return
  }
  func.func @transform_0(%arg0: i32, %arg1: i32) -> (i32, i32) {
    %c0_i32 = arith.constant 0 : i32
    %c0_i32_0 = arith.constant 0 : i32
    %c0_i32_1 = arith.constant 0 : i32
    return %c0_i32, %c0_i32_0 : i32, i32
  }
  func.func @transform_1(%arg0: i32, %arg1: i32) -> (i32, i32) {
    %c0_i32 = arith.constant 0 : i32
    %c0_i32_0 = arith.constant 0 : i32
    %c0_i32_1 = arith.constant 0 : i32
    return %c0_i32, %c0_i32_0 : i32, i32
  }
  func.func @transform_2(%arg0: i32, %arg1: i32) -> (i32, i32, i32) {
    %c0_i32 = arith.constant 0 : i32
    %c0_i32_0 = arith.constant 0 : i32
    %c0_i32_1 = arith.constant 0 : i32
    return %arg0, %c0_i32, %c0_i32_0 : i32, i32, i32
  }
  func.func @transform_3(%arg0: i32, %arg1: i32) -> (i32, i32, i32) {
    %c0_i32 = arith.constant 0 : i32
    %c0_i32_0 = arith.constant 0 : i32
    %c0_i32_1 = arith.constant 0 : i32
    return %arg0, %c0_i32, %c0_i32_0 : i32, i32, i32
  }
  func.func @transform_4(%arg0: i32, %arg1: i32) -> (i32, i32, i32) {
    %c0_i32 = arith.constant 0 : i32
    %c0_i32_0 = arith.constant 0 : i32
    %c0_i32_1 = arith.constant 0 : i32
    return %arg0, %c0_i32, %c0_i32_0 : i32, i32, i32
  }
}

</mosaic_0001>

<bundles_post_ra>
// kernel: finetune_loss.1
= control target key start
LH: loop header
LB: loop body
LE: loop exit
PB: predicated region body
PF: predicated region fallthrough
CT: control target
= control target key end

     0   :  { %s1676_s0 = inlined_call_operand.vmem [shape: f32[2,5], index: 0, kind: input, shape index: {}]   ;;  %s1677_s1 = inlined_call_operand.vmem [shape: f32[2,5], index: 1, kind: input, shape index: {}]   ;;  %s1678_s2 = inlined_call_operand.vmem [shape: f32[2,32,128], index: 2, kind: input, shape index: {}]   ;;  %s1679_s3 = inlined_call_operand.vmem [shape: f32[2,4,128], index: 3, kind: input, shape index: {}]   ;;  %s1680_s4 = inlined_call_operand.vmem [shape: f32[2,1,128], index: 4, kind: output, shape index: {}]  }
   0x1   :  { %1684 = sst [smem:[#allocation11_spill]] %s1676_s0 }
   0x2   :  { %9 = vsyncpa [#allocation6], 0 }
   0x3   :  { %10 = vsyncpa [#allocation8], 0  ;;  %s1464_s15 = smov 0   ;;  %s1466_s16 = smov 0  }
   0x4   :  { %s1468_s17 = smov 0  }
   0x5 LB: > { %s1126_s18 = sadd.s32 4294967295, %s1433_s17   ;;  %s28_s19 = sadd.s32 1, %s1429_s16  ;;  %s1433_s17 = sphi %s1468_s17, %s16_s17   ;;  %s1429_s16 = sphi %s1466_s16, %s1692_s16   ;;  %s1425_s15 = sphi %s1464_s15, %s1691_s15  }
   0x6   : > { %p30_p0 = scmp.ge.s32.totalorder %s28_s19, 2  ;;  %p1128_p1 = scmp.ge.s32.totalorder %s1433_s17, 1 }
   0x7   : > { %p153_p2 = scmp.lt.s32.totalorder %s1433_s17, 3  ;;  %p1489_p4 = scmp.eq.s32.totalorder %s1126_s18, 0 }
   0x8   : > { %s1694_s19 = smov (%p30_p0, %s28_s19), 0  ;;  %s1687_s0 = sld [smem:[#allocation11_spill]] }
   0x9   : > { %p1485_p3 = pnand %p1128_p1, %p153_p2  ;;  %s177_s27 = sshll.u32 %s1677_s1, 4  ;;  %s178_s27 = int_to_ptr.vmem [resolvable:$true] %s177_s27 }
   0xa   : > { %s1686_s21 = scalar_select %p1489_p4, 1, 0 }
   0xb   : > { %s1685_s20 = scalar_select %p1485_p3, 1, 0 }
   0xc   : > { %p1300_p5 = pneg %p1485_p3 }
   0xe   : > { %s166_s24 = sshll.u32 %s1687_s0, 4  ;;  %p1503_p6 = pnand %p1489_p4, %p1300_p5  ;;  %s167_s24 = int_to_ptr.vmem [resolvable:$true] %s166_s24 }
   0xf   : > { %s1373_s29 = scalar_lea.vmem %s167_s24, 32  ;;  %p1381_p11 = scmp.lt.s32.totalorder %s167_s24, %s167_s24 }
  0x10   : > { %p1374_p7 = scmp.ne.s32.totalorder %s167_s24, %s1373_s29  ;;  %p1375_p8 = pneg %p1503_p6 }
  0x11   : > { %p1382_p12 = scmp.lt.s32.totalorder %s1373_s29, %s1373_s29 }
  0x12   : > { %p1376_p9 = pnand %p1375_p8, %p1374_p7 }
  0x13   : > { %p1383_p13 = por %p1382_p12, %p1381_p11 }
  0x14   : > { %p1377_p10 = pneg %p1376_p9 }
  0x16   : > { %p1384_p0 = pnand %p1383_p13, %p1377_p10 }
  0x18   : > { %1387 = shalt.err (!%p1384_p0)
}
  0x19   : > { %s1435_s30 = smov [#allocation5]   ;;  %s1388_s5 = scalar_lea.vmem %s178_s27, 32 }
  0x1a   : > { %1303 = dma.vmem_to_smem (!%p1503_p6), %s167_s24, 32, %s1435_s30, [#allocation6]  }
  0x1b   : > { %p1389_p1 = scmp.ne.s32.totalorder %s178_s27, %s1388_s5  ;;  %p1396_p4 = scmp.lt.s32.totalorder %s178_s27, %s178_s27 }
  0x1c   : > { %p1397_p3 = scmp.lt.s32.totalorder %s1388_s5, %s1388_s5 }
  0x1d   : > { %p1391_p2 = pnand %p1389_p1, %p1375_p8 }
  0x1e   : > { %p1398_p7 = por %p1397_p3, %p1396_p4 }
  0x1f   : > { %p1392_p5 = pneg %p1391_p2 }
  0x21   : > { %p1399_p9 = pnand %p1398_p7, %p1392_p5 }
  0x23   : > { %1402 = shalt.err (!%p1399_p9)
}
  0x24   : > { %s1436_s6 = smov [#allocation7]   ;;  %p1689_p10 = scmp.ne.s32.totalorder %s1685_s20, 0 }
  0x25   : > { %1306 = dma.vmem_to_smem (!%p1503_p6), %s178_s27, 32, %s1436_s6, [#allocation8]  }
  0x26   : > { %205 = sbr.rel (%p1689_p10) target bundleno = 945 (0x3b1), region = 36  ;;  %p1690_p11 = scmp.ne.s32.totalorder (!%p1689_p10), %s1686_s21, 0 }
  0x2b   : > { %1416 = dma.done.wait (%p1690_p11), [#allocation6], 32  }
  0x2c   : > { %1418 = vsyncadd (%p1690_p11), [#allocation6], 4294967264 }
  0x2d   : > { %1420 = dma.done.wait (%p1690_p11), [#allocation8], 32  }
  0x2e   : > { %1422 = vsyncadd (%p1690_p11), [#allocation8], 4294967264 }
  0x2f   : > { %215 = sfence }
  0x30   : > { %p238_p3 = scmp.lt.s32.totalorder %s1425_s15, 1  ;;  %s1525_s7 = sshll.u32 %s1425_s15, 7  ;;  %v1437_v0 = vmov 0.0   ;;  %vm375_vm4 = vcmask 261120   ;;  %v1438_v25 = vmov 1.0  }
  0x31   : > { %s1528_s8 = sadd.s32 1, %s1525_s7  ;;  %258 = vst [vmem:[#allocation2 + $0x28] sm:$0xff] %v1437_v0  ;;  %259 = vst [vmem:[#allocation2 + $0x10] sm:$0xff] %v1437_v0  ;;  %s1548_s10 = sadd.s32 2, %s1525_s7 }
  0x32   : > { %260 = vst [vmem:[#allocation2 + $0x8] sm:$0xff] %v1437_v0  ;;  %261 = vst [vmem:[#allocation2] sm:$0xff] %v1437_v0  ;;  %s1696_s15 = smov (!%p238_p3, %s1425_s15), 1  ;;  %s283_s9 = sld [smem:[#allocation5 + %s1528_s8]] }
  0x33   : > { %262 = vst [vmem:[#allocation2 + $0x18] sm:$0xff] %v1437_v0  ;;  %263 = vst [vmem:[#allocation2 + $0x20] sm:$0x1] %v1437_v0  ;;  %s1194_s11 = sshll.u32 %s1696_s15, 5  ;;  %s1137_s12 = sshll.u32 %s1696_s15, 2 }
  0x34   : > { %264 = vst [vmem:[#allocation3] sm:$0xff] %v1437_v0  ;;  %265 = vst [vmem:[#allocation3 + $0x8] sm:$0xff] %v1437_v0  ;;  %s242_s18 = scalar_lea.vmem %s1678_s2, %s1194_s11  ;;  %s246_s22 = scalar_lea.vmem %s1679_s3, %s1137_s12 }
  0x35   : > { %266 = vst [vmem:[#allocation3 + $0x20] sm:$0xff] %v1437_v0  ;;  %267 = vst [vmem:[#allocation3 + $0x18] sm:$0xff] %v1437_v0  ;;  %s295_s23 = sld [smem:[#allocation5 + %s1548_s10]]  ;;  %s1560_s24 = sadd.s32 3, %s1525_s7  ;;  %v339_v1 = vld [vmem:[%s242_s18] sm:$0xff]  ;;  %v342_v3 = vld [vmem:[%s242_s18 + $0x18] sm:$0xff] }
  0x36   : > { %268 = vst [vmem:[#allocation3 + $0x10] sm:$0xff] %v1437_v0  ;;  %v269_v2 = vld [vmem:[%s246_s22] sm:$0xf]  ;;  %s307_s25 = sld [smem:[#allocation5 + %s1560_s24]]  ;;  %s1564_s26 = sadd.s32 4, %s1525_s7  ;;  %343 = vxpose.xlu0.b32.start [1/4] (short) %v339_v1, 128  ;;  %v340_v4 = vld [vmem:[%s242_s18 + $0x8] sm:$0xff]  ;;  %1229 = vmatprep.subr.mxu0 %v342_v3 }
  0x37   : > { %s319_s27 = sld [smem:[#allocation5 + %s1564_s26]]  ;;  %v341_v6 = vld [vmem:[%s242_s18 + $0x10] sm:$0xff]  ;;  %1230 = vmatpush3.msra.mxu0 %v342_v3  ;;  %330 = vst [vmem:[#allocation2 + $0x20] sm:$0x1] %v1438_v25 }
  0x38   : > { %v285_v5 = vstv %s283_s9  ;;  %1231 = vmatprep.subr.mxu0 %v341_v6  ;;  %s271_s28 = sld [smem:[#allocation5 + %s1525_s7]] }
  0x39   : > { %vm286_vm0 = vcmp.gt.f32.partialorder %v269_v2, %v285_v5  ;;  %1232 = vmatpush3.msra.mxu0 %v341_v6  ;;  %s284_s29 = sld [smem:[#allocation7 + %s1528_s8]] }
  0x3a   : > { %v1141_v7 = vsel %vm286_vm0, 1.0, %v1437_v0  ;;  %344 = vxpose.xlu0.b32.cont [2/4] (short) %v340_v4, 128  ;;  %1233 = vmatprep.subr.mxu0 %v340_v4  ;;  %s272_s30 = sld [smem:[#allocation7 + %s1525_s7]] }
  0x3b   : > { %v297_v8 = vstv %s295_s23  ;;  %289 = vst [vmem:[#allocation2 + $0x10] sm:$0xf] %v1141_v7  ;;  %1234 = vmatpush3.msra.mxu0 %v340_v4  ;;  %v1142_v26 = vadd.f32 -1.0, %v1141_v7  ;;  %s308_s5 = sld [smem:[#allocation7 + %s1560_s24]] }
  0x3c   : > { %vm298_vm1 = vcmp.gt.f32.partialorder %v269_v2, %v297_v8  ;;  %v309_v9 = vstv %s307_s25  ;;  %1235 = vmatprep.subr.mxu0 %v339_v1  ;;  %s296_s6 = sld [smem:[#allocation7 + %s1548_s10]] }
  0x3d   : > { %v1569_v10 = vsel %vm298_vm1, 1.0, %v1437_v0  ;;  %vm310_vm2 = vcmp.gt.f32.partialorder %v269_v2, %v309_v9  ;;  %v321_v11 = vstv %s319_s27  ;;  %1236 = vmatpush3.msra.mxu0 %v339_v1  ;;  %s320_s9 = sld [smem:[#allocation7 + %s1564_s26]] }
  0x3e   : > { %v1572_v12 = vsel %vm310_vm2, 1.0, %v1437_v0  ;;  %vm322_vm3 = vcmp.gt.f32.partialorder %v269_v2, %v321_v11  ;;  %301 = vst [vmem:[#allocation2 + $0x8] sm:$0xf] %v1569_v10  ;;  %345 = vxpose.xlu0.b32.cont [3/4] (short) %v341_v6, 128  ;;  %v273_v22 = vstv %s271_s28  ;;  %s1010_s12 = sld [smem:[#allocation7 + %s1525_s7]] }
  0x3f   : > { %v1576_v13 = vsel %vm322_vm3, 1.0, %v1437_v0  ;;  %313 = vst [vmem:[#allocation2] sm:$0xf] %v1572_v12  ;;  %vm274_vm5 = vcmp.gt.f32.partialorder %v269_v2, %v273_v22  ;;  %v291_v27 = vstv %s284_s29  ;;  %s1012_s13 = sld [smem:[#allocation7 + %s1528_s8]] }
  0x40   : > { %325 = vst [vmem:[#allocation2 + $0x18] sm:$0xf] %v1576_v13  ;;  %v1590_v23 = vsel %vm274_vm5, 1.0, %v1437_v0  ;;  %v292_v28 = vmul.f32 %v1142_v26, %v291_v27  ;;  %v777_v27 = vlaneseq  ;;  %s1015_s14 = sld [smem:[#allocation7 + %s1548_s10]] }
  0x41   : > { %277 = vst [vmem:[#allocation2 + $0x28] sm:$0xf] %v1590_v23  ;;  %s1018_s18 = sld [smem:[#allocation7 + %s1560_s24]] }
  0x42   : > { %346 = vxpose.xlu0.b32.end [4/4] (short) %v342_v3, 128  ;;  %293 = vst [vmem:[#allocation3 + $0x8] sm:$0xf] %v292_v28  ;;  %s1021_s21 = sld [smem:[#allocation7 + %s1564_s26]] }
  0x45   : > { %s1013_s20 = sadd.f32 %s1012_s13, %s1010_s12 }
  0x47   : > { %s1016_s22 = sadd.f32 %s1015_s14, %s1013_s20 }
  0x48   : > { %v862_v24 = vld [vmem:[#allocation2 + $0x28] sm:$0xff] }
  0x49   : > { %1277 = vmatprep.mubr.f32.mxu1 %v862_v24  ;;  %s1019_s23 = sadd.f32 %s1018_s18, %s1016_s22 }
  0x4b   : > { %s1022_s25 = sadd.f32 %s1021_s21, %s1019_s23 }
  0x4d   : > { %s1030_s28 = smul.f32 4.0, %s1022_s25 }
  0xb2   : > { %v359_v14 = vpop.trf.xlu0 }
  0xb3   : > { %1237 = vmatprep.mubr.msk.f32.mxu0 %vm375_vm4, %v359_v14 }
  0xb6   : > { %v360_v15 = vpop.trf.xlu0 }
  0xb7   : > { %1238 = vmatmul.mubr.msk.f32.vlgmr.msra.gmra.mxu0 %vm375_vm4, %v360_v15 }
  0xba   : > { %v361_v16 = vpop.trf.xlu0 }
  0xbb   : > { %1240 = vmatprep.mubr.msk.f32.mxu0 %vm375_vm4, %v361_v16 }
  0xbe   : > { %v362_v17 = vpop.trf.xlu0 }
  0xbf   : > { %1241 = vmatmul.mubr.msk.f32.gmra.mxu0 %vm375_vm4, %v362_v17 }
  0xc2   : > { %v363_v18 = vpop.trf.xlu0 }
  0xc3   : > { %1243 = vmatprep.mubr.msk.f32.mxu0 %vm375_vm4, %v363_v18 }
  0xc6   : > { %v364_v19 = vpop.trf.xlu0 }
  0xc7   : > { %1244 = vmatmul.mubr.msk.f32.gmra.mxu0 %vm375_vm4, %v364_v19 }
  0xca   : > { %v365_v20 = vpop.trf.xlu0 }
  0xcb   : > { %1246 = vmatprep.mubr.msk.f32.mxu0 %vm375_vm4, %v365_v20 }
  0xce   : > { %v366_v21 = vpop.trf.xlu0 }
  0xcf   : > { %1247 = vmatmul.mubr.msk.f32.gmra.mxu0 %vm375_vm4, %v366_v21 }
 0x177   : > { %v1239_v29 = vpop.f32.mrf.mxu0 }
 0x178   : > { %v1166_v51 = vclamps-f32 %v1239_v29, 0.9999999 }
 0x179   : > { %v490_v30 = vpop.f32.mrf.mxu0 }
 0x17a   : > { %v1165_v55 = vclamps-f32 %v490_v30, 0.9999999  ;;  %v602_v56 = vmul.f32 2.0, %v1166_v51 }
 0x17c   : > { %v601_v58 = vmul.f32 2.0, %v1165_v55  ;;  %v1599_v59 = vsub.f32 2.0, %v602_v56 }
 0x17e   : > { %v1602_v61 = vsub.f32 2.0, %v601_v58  ;;  %vm642_vm2 = vcmp.eq.f32.partialorder %v1599_v59, inf  ;;  %vm644_vm5 = vcmp.eq.f32.partialorder %v1599_v59, 0.0 }
 0x17f   : > { %v1242_v31 = vpop.f32.mrf.mxu0 }
 0x180   : > { %v1168_v39 = vclamps-f32 %v1242_v31, 0.9999999 }
 0x181   : > { %v500_v32 = vpop.f32.mrf.mxu0 }
 0x182   : > { %v604_v45 = vmul.f32 2.0, %v1168_v39  ;;  %v1167_v46 = vclamps-f32 %v500_v32, 0.9999999 }
 0x184   : > { %v620_v52 = vsub.f32 2.0, %v604_v45  ;;  %v603_v53 = vmul.f32 2.0, %v1167_v46 }
 0x186   : > { %v1597_v57 = vsub.f32 2.0, %v603_v53  ;;  %vm656_vm14 = vcmp.eq.f32.partialorder %v620_v52, inf  ;;  %v659_v31 = vand.u32 2147483648, %v620_v52  ;;  %vm658_vm15 = vcmp.eq.f32.partialorder %v620_v52, 0.0 }
 0x187   : > { %v1245_v33 = vpop.f32.mrf.mxu0 }
 0x188   : > { %v1170_v34 = vclamps-f32 %v1245_v33, 0.9999999  ;;  %vm649_vm0 = vcmp.eq.f32.partialorder %v1597_v57, inf  ;;  %vm651_vm1 = vcmp.eq.f32.partialorder %v1597_v57, 0.0 }
 0x189   : > { %v510_v35 = vpop.f32.mrf.mxu0 }
 0x18a   : > { %v606_v36 = vmul.f32 2.0, %v1170_v34  ;;  %v1169_v37 = vclamps-f32 %v510_v35, 0.9999999  ;;  %v778_v34 = vand.u32 127, %v777_v27 }
 0x18c   : > { %v605_v38 = vmul.f32 2.0, %v1169_v37  ;;  %v622_v40 = vsub.f32 2.0, %v606_v36  ;;  %vm813_vm3 = vcmp.lt.s32.totalorder %v778_v34, 64 }
 0x18e   : > { %v1594_v43 = vsub.f32 2.0, %v605_v38  ;;  %1339 = vrsqrt.f32 %v622_v40  ;;  %vm670_vm6 = vcmp.eq.f32.partialorder %v622_v40, inf  ;;  %v673_v8 = vand.u32 2147483648, %v622_v40 }
 0x18f   : > { %v1248_v41 = vpop.f32.mrf.mxu0  ;;  %vm672_vm9 = vcmp.eq.f32.partialorder %v622_v40, 0.0  ;;  %v652_v38 = vand.u32 2147483648, %v1597_v57 }
 0x190   : > { %v1172_v42 = vclamps-f32 %v1248_v41, 0.9999999  ;;  %1341 = vrsqrt.f32 %v1594_v43  ;;  %vm663_vm11 = vcmp.eq.f32.partialorder %v1594_v43, inf  ;;  %v666_v22 = vand.u32 2147483648, %v1594_v43 }
 0x191   : > { %v520_v44 = vpop.f32.mrf.mxu0  ;;  %vm665_vm13 = vcmp.eq.f32.partialorder %v1594_v43, 0.0 }
 0x192   : > { %v608_v47 = vmul.f32 2.0, %v1172_v42  ;;  %v1171_v48 = vclamps-f32 %v520_v44, 0.9999999  ;;  %v645_v44 = vand.u32 2147483648, %v1599_v59 }
 0x194   : > { %v624_v49 = vsub.f32 2.0, %v608_v47  ;;  %v607_v50 = vmul.f32 2.0, %v1171_v48 }
 0x196   : > { %1343 = vrsqrt.f32 %v624_v49  ;;  %v623_v54 = vsub.f32 2.0, %v607_v50  ;;  %vm684_vm7 = vcmp.eq.f32.partialorder %v624_v49, inf  ;;  %v687_v2 = vand.u32 2147483648, %v624_v49 }
 0x197   : > { %vm686_vm8 = vcmp.eq.f32.partialorder %v624_v49, 0.0 }
 0x198   : > { %1345 = vrsqrt.f32 %v623_v54  ;;  %vm677_vm10 = vcmp.eq.f32.partialorder %v623_v54, inf  ;;  %v680_v14 = vand.u32 2147483648, %v623_v54  ;;  %vm679_vm12 = vcmp.eq.f32.partialorder %v623_v54, 0.0 }
 0x199   : > { %1347 = vrsqrt.f32 %v620_v52 }
 0x19a   : > { %1349 = vrsqrt.f32 %v1597_v57 }
 0x19b   : > { %v1340_v60 = vpop.eup %1339  ;;  %1351 = vrsqrt.f32 %v1599_v59 }
 0x19c   : > { %v669_v63 = vmul.f32 %v1340_v60, %v622_v40  ;;  %1353 = vrsqrt.f32 %v1602_v61  ;;  %v864_v60 = vld [vmem:[#allocation2 + $0x8] sm:$0xff] }
 0x19d   : > { %v1342_v62 = vpop.eup %1341 }
 0x19e   : > { %v671_v4 = vsel %vm670_vm6, %v622_v40, %v669_v63  ;;  %v662_v5 = vmul.f32 %v1342_v62, %v1594_v43  ;;  %vm635_vm6 = vcmp.eq.f32.partialorder %v1602_v61, inf  ;;  %v866_v62 = vld [vmem:[#allocation2 + $0x18] sm:$0xff]  ;;  %v867_v63 = vld [vmem:[#allocation2 + $0x20] sm:$0x1] }
 0x19f   : > { %v674_v16 = vsel %vm672_vm9, %v673_v8, %v671_v4  ;;  %v1148_v8 = vadd.f32 -1.0, %v1576_v13 }
 0x1a0   : > { %v664_v19 = vsel %vm663_vm11, %v1594_v43, %v662_v5  ;;  %v750_v25 = vmul.f32 0.5, %v674_v16  ;;  %v315_v5 = vstv %s308_s5 }
 0x1a1   : > { %v667_v26 = vsel %vm665_vm13, %v666_v22, %v664_v19 }
 0x1a2   : > { %v749_v32 = vmul.f32 0.5, %v667_v26 }
 0x1a3   : > { %v1344_v0 = vpop.eup %1343 }
 0x1a4   : > { %v683_v1 = vmul.f32 %v1344_v0, %v624_v49  ;;  %v1140_v0 = vadd.f32 -1.0, %v1590_v23  ;;  %v367_v23 = vpop.trf.xlu0 }
 0x1a5   : > { %v1346_v3 = vpop.eup %1345  ;;  %1249 = vmatprep.mubr.msk.f32.mxu0 %vm375_vm4, %v367_v23 }
 0x1a6   : > { %v685_v6 = vsel %vm684_vm7, %v624_v49, %v683_v1  ;;  %v1348_v7 = vpop.eup %1347  ;;  %v676_v9 = vmul.f32 %v1346_v3, %v623_v54  ;;  %v638_v49 = vand.u32 2147483648, %v1602_v61  ;;  %vm637_vm7 = vcmp.eq.f32.partialorder %v1602_v61, 0.0 }
 0x1a7   : > { %v688_v11 = vsel %vm686_vm8, %v687_v2, %v685_v6  ;;  %v655_v18 = vmul.f32 %v1348_v7, %v620_v52  ;;  %v1350_v21 = vpop.eup %1349  ;;  %v1146_v1 = vadd.f32 -1.0, %v1572_v12  ;;  %v279_v2 = vstv %s272_s30 }
 0x1a8   : > { %v752_v15 = vmul.f32 0.5, %v688_v11  ;;  %v678_v17 = vsel %vm677_vm10, %v623_v54, %v676_v9  ;;  %v648_v29 = vmul.f32 %v1350_v21, %v1597_v57  ;;  %v1352_v30 = vpop.eup %1351  ;;  %v1144_v3 = vadd.f32 -1.0, %v1569_v10  ;;  %v368_v12 = vpop.trf.xlu0  ;;  %v965_v21 = vld [vmem:[#allocation3 + $0x8] sm:$0xff] }
 0x1a9   : > { %v681_v20 = vsel %vm679_vm12, %v680_v14, %v678_v17  ;;  %v657_v28 = vsel %vm656_vm14, %v620_v52, %v655_v18  ;;  %v1354_v35 = vpop.eup %1353  ;;  %v641_v36 = vmul.f32 %v1352_v30, %v1599_v59  ;;  %v280_v4 = vmul.f32 %v1140_v0, %v279_v2  ;;  %1250 = vmatmul.mubr.msk.f32.gmra.mxu0 %vm375_vm4, %v368_v12 }
 0x1aa   : > { %1355 = vtanh.f32 %v752_v15  ;;  %v751_v24 = vmul.f32 0.5, %v681_v20  ;;  %v660_v33 = vsel %vm658_vm15, %v659_v31, %v657_v28  ;;  %v650_v37 = vsel %vm649_vm0, %v1597_v57, %v648_v29 }
 0x1ab   : > { %v748_v39 = vmul.f32 0.5, %v660_v33  ;;  %v653_v40 = vsel %vm651_vm1, %v652_v38, %v650_v37  ;;  %v643_v41 = vsel %vm642_vm2, %v1599_v59, %v641_v36  ;;  %v634_v42 = vmul.f32 %v1354_v35, %v1602_v61  ;;  %v863_v59 = vld [vmem:[#allocation2 + $0x10] sm:$0xff]  ;;  %281 = vst [vmem:[#allocation3] sm:$0xf] %v280_v4 }
 0x1ac   : > { %1357 = vtanh.f32 %v751_v24  ;;  %v747_v45 = vmul.f32 0.5, %v653_v40  ;;  %v646_v46 = vsel %vm644_vm5, %v645_v44, %v643_v41  ;;  %v316_v6 = vmul.f32 %v1146_v1, %v315_v5  ;;  %v369_v10 = vpop.trf.xlu0 }
 0x1ad   : > { %1359 = vtanh.f32 %v750_v25  ;;  %v636_v48 = vsel %vm635_vm6, %v1602_v61, %v634_v42  ;;  %v746_v50 = vmul.f32 0.5, %v646_v46  ;;  %v865_v61 = vld [vmem:[#allocation2] sm:$0xff]  ;;  %v303_v7 = vstv %s296_s6  ;;  %1252 = vmatprep.mubr.msk.f32.mxu0 %vm375_vm4, %v369_v10 }
 0x1ae   : > { %1361 = vtanh.f32 %v749_v32  ;;  %v639_v52 = vsel %vm637_vm7, %v638_v49, %v636_v48  ;;  %317 = vst [vmem:[#allocation3 + $0x18] sm:$0xf] %v316_v6  ;;  %v304_v9 = vmul.f32 %v1144_v3, %v303_v7  ;;  %v327_v11 = vstv %s320_s9 }
 0x1af   : > { %1363 = vtanh.f32 %v748_v39  ;;  %v745_v53 = vmul.f32 0.5, %v639_v52  ;;  %v328_v14 = vmul.f32 %v1148_v8, %v327_v11  ;;  %vm970_vm8 = vcmask 1040384  }
 0x1b0   : > { %1365 = vtanh.f32 %v747_v45  ;;  %305 = vst [vmem:[#allocation3 + $0x20] sm:$0xf] %v304_v9  ;;  %v370_v15 = vpop.trf.xlu0 }
 0x1b1   : > { %1367 = vtanh.f32 %v746_v50  ;;  %329 = vst [vmem:[#allocation3 + $0x10] sm:$0xf] %v328_v14  ;;  %1253 = vmatmul.mubr.msk.f32.gmra.mxu0 %vm375_vm4, %v370_v15 }
 0x1b2   : > { %1369 = vtanh.f32 %v745_v53  ;;  %v964_v20 = vld [vmem:[#allocation3] sm:$0xff] }
 0x1b4   : > { %v371_v16 = vpop.trf.xlu0 }
 0x1b5   : > { %1255 = vmatprep.mubr.msk.f32.mxu0 %vm375_vm4, %v371_v16  ;;  %v967_v28 = vld [vmem:[#allocation3 + $0x18] sm:$0xff] }
 0x1b7   : > { %v1356_v43 = vpop.eup %1355  ;;  %v966_v26 = vld [vmem:[#allocation3 + $0x20] sm:$0xff] }
 0x1b8   : > { %1261 = vmatprep.subr.msk.mxu1 %vm813_vm3, %v1356_v43  ;;  %v372_v13 = vpop.trf.xlu0  ;;  %v968_v33 = vld [vmem:[#allocation3 + $0x10] sm:$0xff] }
 0x1b9   : > { %1262 = vmatpush3.xpose.msk.msra.mxu1 %vm813_vm3, %v1356_v43  ;;  %v1358_v47 = vpop.eup %1357  ;;  %1256 = vmatmul.mubr.msk.f32.gmra.mxu0 %vm375_vm4, %v372_v13 }
 0x1ba   : > { %1263 = vmatprep.subr.msk.mxu1 %vm813_vm3, %v1358_v47  ;;  %v1360_v51 = vpop.eup %1359 }
 0x1bb   : > { %v1362_v54 = vpop.eup %1361 }
 0x1bc   : > { %v1364_v55 = vpop.eup %1363  ;;  %v373_v17 = vpop.trf.xlu0 }
 0x1bd   : > { %1264 = vmatpush3.xpose.msk.msra.mxu1 %vm813_vm3, %v1358_v47  ;;  %v1366_v56 = vpop.eup %1365  ;;  %1258 = vmatprep.mubr.msk.f32.mxu0 %vm375_vm4, %v373_v17 }
 0x1be   : > { %1265 = vmatprep.subr.msk.mxu1 %vm813_vm3, %v1360_v51  ;;  %v1368_v57 = vpop.eup %1367 }
 0x1bf   : > { %v1370_v58 = vpop.eup %1369 }
 0x1c0   : > { %v374_v18 = vpop.trf.xlu0 }
 0x1c1   : > { %1266 = vmatpush3.xpose.msk.msra.mxu1 %vm813_vm3, %v1360_v51  ;;  %1259 = vmatmul.mubr.msk.f32.gmra.mxu0 %vm375_vm4, %v374_v18 }
 0x1c2   : > { %1267 = vmatprep.subr.msk.mxu1 %vm813_vm3, %v1362_v54 }
 0x1c5   : > { %1268 = vmatpush3.xpose.msk.msra.mxu1 %vm813_vm3, %v1362_v54 }
 0x1c6   : > { %1269 = vmatprep.subr.msk.mxu1 %vm813_vm3, %v1364_v55 }
 0x1c9   : > { %1270 = vmatpush3.xpose.msk.msra.mxu1 %vm813_vm3, %v1364_v55 }
 0x1ca   : > { %1271 = vmatprep.subr.msk.mxu1 %vm813_vm3, %v1366_v56 }
 0x1cd   : > { %1272 = vmatpush3.xpose.msk.msra.mxu1 %vm813_vm3, %v1366_v56 }
 0x1ce   : > { %1273 = vmatprep.subr.msk.mxu1 %vm813_vm3, %v1368_v57 }
 0x1d1   : > { %1274 = vmatpush3.xpose.msk.msra.mxu1 %vm813_vm3, %v1368_v57 }
 0x1d2   : > { %1275 = vmatprep.subr.msk.mxu1 %vm813_vm3, %v1370_v58 }
 0x1d5   : > { %1276 = vmatpush3.xpose.msk.msra.mxu1 %vm813_vm3, %v1370_v58 }
 0x1d8   : > { %1278 = vmatmul.mubr.f32.vlgmr.msra.gmra.mxu1 %v863_v59 }
 0x1d9   : > { %1280 = vmatprep.mubr.f32.mxu1 %v864_v60 }
 0x1dc   : > { %1281 = vmatmul.mubr.f32.gmra.mxu1 %v865_v61 }
 0x1dd   : > { %1283 = vmatprep.mubr.f32.mxu1 %v866_v62 }
 0x1e0   : > { %1284 = vmatmul.mubr.f32.gmra.mxu1 %v867_v63 }
 0x269   : > { %v1251_v41 = vpop.f32.mrf.mxu0 }
 0x26b   : > { %v530_v42 = vpop.f32.mrf.mxu0 }
 0x271   : > { %v1254_v43 = vpop.f32.mrf.mxu0 }
 0x273   : > { %v540_v44 = vpop.f32.mrf.mxu0 }
 0x279   : > { %v1257_v45 = vpop.f32.mrf.mxu0 }
 0x27b   : > { %v550_v46 = vpop.f32.mrf.mxu0 }
 0x281   : > { %v1260_v47 = vpop.f32.mrf.mxu0 }
 0x283   : > { %v560_v48 = vpop.f32.mrf.mxu0 }
 0x298   : > { %v1279_v19 = vpop.f32.mrf.mxu1 }
 0x299   : > { %v986_v27 = vmul.f32 %v1279_v19, %v965_v21 }
 0x29a   : > { %v934_v22 = vpop.f32.mrf.mxu1 }
 0x29b   : > { %v985_v24 = vmul.f32 %v964_v20, %v934_v22 }
 0x29c   : > { %v1282_v25 = vpop.f32.mrf.mxu1 }
 0x29d   : > { %v990_v30 = vadd.f32 %v986_v27, %v985_v24  ;;  %v988_v34 = vmul.f32 %v1282_v25, %v967_v28 }
 0x29e   : > { %v944_v29 = vpop.f32.mrf.mxu1 }
 0x29f   : > { %v987_v31 = vmul.f32 %v966_v26, %v944_v29 }
 0x2a0   : > { %v1285_v32 = vpop.f32.mrf.mxu1 }
 0x2a1   : > { %v991_v35 = vadd.f32 %v990_v30, %v987_v31  ;;  %v971_v36 = vsel %vm970_vm8, %v1285_v32, 0.0 }
 0x2a2   : > { %972 = vadd.xlane.f32.xlu1 %v971_v36  ;;  %v954_v37 = vpop.f32.mrf.mxu1 }
 0x2a3   : > { %v989_v38 = vmul.f32 %v968_v33, %v954_v37  ;;  %v992_v39 = vadd.f32 %v991_v35, %v988_v34 }
 0x2a5   : > { %v993_v40 = vadd.f32 %v992_v39, %v989_v38 }
 0x2a7   : > { %994 = vadd.xlane.f32.xlu1 %v993_v40 }
 0x32b   : > { %v973_v49 = vpop.xlane.xlu1 %972 }
 0x32c   : > { %v974_v50 = vrot.slane %v973_v49, 4 }
 0x32e   : > { %v975_v51 = vadd.f32 %v974_v50, %v973_v49 }
 0x330   : > { %v976_v52 = vrot.slane %v975_v51, 2  ;;  %v995_v53 = vpop.xlane.xlu1 %994 }
 0x331   : > { %v996_v54 = vrot.slane %v995_v53, 4 }
 0x332   : > { %v977_v55 = vadd.f32 %v976_v52, %v975_v51 }
 0x333   : > { %v997_v56 = vadd.f32 %v996_v54, %v995_v53 }
 0x334   : > { %v978_v57 = vrot.slane %v977_v55, 1 }
 0x335   : > { %v998_v58 = vrot.slane %v997_v56, 2 }
 0x336   : > { %v979_v59 = vadd.f32 %v978_v57, %v977_v55 }
 0x337   : > { %v999_v60 = vadd.f32 %v998_v58, %v997_v56 }
 0x338   : > { %1286 = vpush %v979_v59 }
 0x339   : > { %v1000_v61 = vrot.slane %v999_v60, 1 }
 0x33b   : > { %v1001_v62 = vadd.f32 %v1000_v61, %v999_v60 }
 0x33d   : > { %1288 = vpush %v1001_v62 }
 0x369   : > { %s1287_s11 = spop %1286 }
 0x36a   : > { %v1026_v63 = vstv %s1287_s11  ;;  %s249_s11 = scalar_lea.vmem %s1680_s4, %s1696_s15 }
 0x36b   : > { %1371 = vrcp.f32 %v1026_v63 }
 0x36e   : > { %s1289_s27 = spop %1288 }
 0x36f   : > { %s1024_s29 = smul.f32 2.0, %s1289_s27 }
 0x378   : > { %v1372_v0 = vpop.eup %1371 }
 0x379   : > { %1290 = vpush %v1372_v0 }
 0x3aa   : > { %s1291_s30 = spop %1290 }
 0x3ab   : > { %s1029_s5 = smul.f32 %s1291_s30, %s1024_s29 }
 0x3ad   : > { %s1031_s0 = sadd.f32 %s1030_s28, %s1029_s5 }
 0x3af   : > { %v1032_v1 = vstv %s1031_s0 }
 0x3b0   : > { %1033 = vst [vmem:[%s249_s11] sm:$0x1] %v1032_v1 }
 0x3b1 PF: > { %s16_s17 = sadd.s32 1, %s1433_s17   ;;  %s1691_s15 = smov %s1429_s16 }
 0x3b2   : > { %p13_p4 = scmp.ge.s32.totalorder %s16_s17, 4   ;;  %s1692_s16 = smov %s1694_s19 }
 0x3b4   :  { %15 = sbr.rel (!%p13_p4) target bundleno = 5 (0x5), region = 92 }
 0x3b9   :  { %1051 = vsyncpa [#allocation6], 1 }
 0x3ba   :  { %1053 = vsyncpa [#allocation6 + $0x1], 1 }
 0x3bb   :  { %1054 = vsyncpa [#allocation8], 1 }

</bundles_post_ra>
